<compile_context>
chip_gen: v5e
topology: v5e:2x2
jax: 0.10.0
libtpu: 0.0.40
codegen_flags: <defaults>
</compile_context>

<pallas_src>
import jax
import jax.numpy as jnp
from jax.experimental import pallas as pl
from jax.experimental.pallas import tpu as pltpu


def _lora_kernel(x_ref, w_ref, b_ref, a_ref, bb_ref, o_ref, acc_ref, xa_ref):
    # x:(tm,tk)  w:(tn,tk)  b:(1,tn)  a:(Rp,tk)  bb:(tn,Rp)  o:(tm,tn)
    j = pl.program_id(1)           # N-tile index
    k = pl.program_id(2)           # K-tile index (reduction, innermost)
    nk = pl.num_programs(2)

    @pl.when(k == 0)
    def _():
        acc_ref[...] = jnp.zeros_like(acc_ref)

    @pl.when(jnp.logical_and(j == 0, k == 0))
    def _():
        xa_ref[...] = jnp.zeros_like(xa_ref)

    x = x_ref[...]

    # Base GEMM partial: contract K of x against K of W (W stays (tn, tk)).
    acc_ref[...] += jax.lax.dot_general(
        x, w_ref[...], (((1,), (1,)), ((), ())),
        preferred_element_type=jnp.float32)

    # LoRA down-projection xa = x @ A.T, accumulated over K.
    # Only computed for the first N tile; scratch persists across the N axis.
    @pl.when(j == 0)
    def _():
        xa_ref[...] += jax.lax.dot_general(
            x, a_ref[...], (((1,), (1,)), ((), ())),
            preferred_element_type=jnp.float32)

    @pl.when(k == nk - 1)
    def _():
        # LoRA up-projection (scaling already folded into bb) + bias epilogue.
        lora = jax.lax.dot_general(
            xa_ref[...], bb_ref[...], (((1,), (1,)), ((), ())),
            preferred_element_type=jnp.float32)
        o_ref[...] = (acc_ref[...] + b_ref[...] + lora).astype(o_ref.dtype)


def _round_up(v, m):
    return ((v + m - 1) // m) * m


def lora_forward(x, w, b, lora_a, lora_b, scaling=1.0, *, tm=None, tn=None, tk=None):
    M, K = x.shape
    N = w.shape[0]
    R = lora_a.shape[0]

    # Fold scaling into B once so the kernel hot loop has no per-element scale.
    bb_scaled = lora_b * jnp.asarray(scaling, lora_b.dtype)

    # Tile sizes: lane-dense (multiples of 128) on N/K, >=8 sublanes on M,
    # LoRA rank padded to the f32 sublane multiple.  Sized conservatively so
    # double-buffered tiles fit v7x's 64 MiB VMEM as well as v5e/v6e.
    Mp = _round_up(M, 8)
    tm = tm or min(Mp, 256)
    Mp = _round_up(Mp, tm)
    Np = _round_up(N, 128)
    tn = tn or min(Np, 512)
    Np = _round_up(Np, tn)
    Kp = _round_up(K, 128)
    tk = tk or min(Kp, 512)
    Kp = _round_up(Kp, tk)
    Rp = _round_up(R, 8)

    # Zero-pad operands so every BlockSpec tile is full-extent / aligned.
    xp = jnp.zeros((Mp, Kp), x.dtype).at[:M, :K].set(x)
    wp = jnp.zeros((Np, Kp), w.dtype).at[:N, :K].set(w)
    bp = jnp.zeros((1, Np), b.dtype).at[0, :N].set(b)
    ap = jnp.zeros((Rp, Kp), lora_a.dtype).at[:R, :K].set(lora_a)
    bbp = jnp.zeros((Np, Rp), lora_b.dtype).at[:N, :R].set(bb_scaled)

    grid = (Mp // tm, Np // tn, Kp // tk)

    out_padded = pl.pallas_call(
        _lora_kernel,
        out_shape=jax.ShapeDtypeStruct((Mp, Np), x.dtype),
        grid_spec=pltpu.PrefetchScalarGridSpec(
            num_scalar_prefetch=0,
            grid=grid,
            in_specs=[
                pl.BlockSpec((tm, tk), lambda i, j, k: (i, k)),   # x
                pl.BlockSpec((tn, tk), lambda i, j, k: (j, k)),   # W
                pl.BlockSpec((1, tn), lambda i, j, k: (0, j)),    # bias
                pl.BlockSpec((Rp, tk), lambda i, j, k: (0, k)),   # lora_A
                pl.BlockSpec((tn, Rp), lambda i, j, k: (j, 0)),   # lora_B * scaling
            ],
            out_specs=pl.BlockSpec((tm, tn), lambda i, j, k: (i, j)),
            scratch_shapes=[
                pltpu.VMEM((tm, tn), jnp.float32),   # base accumulator
                pltpu.VMEM((tm, Rp), jnp.float32),   # cached xa = x @ A.T
            ],
        ),
        compiler_params=pltpu.CompilerParams(
            # M parallel (megacore / v7x 2 TCs); N and K stay "arbitrary" so the
            # xa cache-on-first-N-tile and K accumulation remain well ordered.
            dimension_semantics=("parallel", "arbitrary", "arbitrary"),
            vmem_limit_bytes=48 * 1024 * 1024,
        ),
    )(xp, wp, bp, ap, bbp)

    return out_padded[:M, :N]


if __name__ == "__main__":
    # Small shapes consistent with the module: batch=8, in=32, out=32, rank=4.
    batch, in_features, out_features, rank = 8, 32, 32, 4
    key = jax.random.PRNGKey(0)
    kx, kw, kb, ka = jax.random.split(key, 4)

    x = jax.random.normal(kx, (batch, in_features), dtype=jnp.float32)

    # Deterministic parameter init (mirrors nn.Linear + LoRA init shapes).
    bound = 1.0 / jnp.sqrt(in_features)
    w = jax.random.uniform(kw, (out_features, in_features),
                           minval=-bound, maxval=bound, dtype=jnp.float32)
    b = jax.random.uniform(kb, (out_features,),
                           minval=-bound, maxval=bound, dtype=jnp.float32)
    lora_a = jax.random.normal(ka, (rank, in_features), dtype=jnp.float32) * 0.01
    lora_b = jnp.zeros((out_features, rank), dtype=jnp.float32)  # module init
    scaling = 1.0

    out = lora_forward(x, w, b, lora_a, lora_b, scaling)
    out = jax.block_until_ready(out)

    # Reference check in plain JAX.
    ref = x @ w.T + b + (x @ lora_a.T @ lora_b.T) * scaling
    assert jnp.allclose(out, ref, atol=1e-5, rtol=1e-5), "mismatch vs reference"

    print("KERNEL_OK")
</pallas_src>

<mosaic_0001>
module attributes {stable_mosaic.version = 11 : i64} {
  func.func @_lora_kernel(%arg0: i32, %arg1: i32, %arg2: i32, %arg3: memref<8x128xf32, #tpu.memory_space<vmem>>, %arg4: memref<128x128xf32, #tpu.memory_space<vmem>>, %arg5: memref<1x128xf32, #tpu.memory_space<vmem>>, %arg6: memref<8x128xf32, #tpu.memory_space<vmem>>, %arg7: memref<128x8xf32, #tpu.memory_space<vmem>>, %arg8: memref<8x128xf32, #tpu.memory_space<vmem>>, %arg9: memref<8x128xf32, #tpu.memory_space<vmem>>, %arg10: memref<8x8xf32, #tpu.memory_space<vmem>>) attributes {dimension_semantics = [#tpu.dimension_semantics<parallel>, #tpu.dimension_semantics<arbitrary>, #tpu.dimension_semantics<arbitrary>], iteration_bounds = array<i64: 1, 1, 1>, scalar_prefetch = 0 : i64, scratch_operands = 2 : i64, tpu.core_type = #tpu.core_type<tc>, window_params = [{transform_indices = @transform_0, window_bounds = array<i64: 8, 128>}, {transform_indices = @transform_1, window_bounds = array<i64: 128, 128>}, {transform_indices = @transform_2, window_bounds = array<i64: 1, 128>}, {transform_indices = @transform_3, window_bounds = array<i64: 8, 128>}, {transform_indices = @transform_4, window_bounds = array<i64: 128, 8>}, {transform_indices = @transform_5, window_bounds = array<i64: 8, 128>}]} {
    %c0_i32 = arith.constant 0 : i32
    %0 = arith.cmpi eq, %arg2, %c0_i32 : i32
    %1 = arith.extui %0 : i1 to i32
    %c0_i32_0 = arith.constant 0 : i32
    %2 = arith.cmpi ne, %1, %c0_i32_0 : i32
    scf.if %2 {
      %cst_15 = arith.constant 0.000000e+00 : f32
      %20 = vector.broadcast %cst_15 : f32 to vector<8x128xf32>
      %c0_16 = arith.constant 0 : index
      %c0_17 = arith.constant 0 : index
      %21 = vector.load %arg9[%c0_16, %c0_17] : memref<8x128xf32, #tpu.memory_space<vmem>>, vector<8x128xf32>
      tpu.vector_store %arg9[%c0_16, %c0_17], %20 {strides = array<i32>} : memref<8x128xf32, #tpu.memory_space<vmem>>, vector<8x128xf32>,
    } else {
    }
    %c0_i32_1 = arith.constant 0 : i32
    %3 = arith.cmpi eq, %arg1, %c0_i32_1 : i32
    %c0_i32_2 = arith.constant 0 : i32
    %4 = arith.cmpi eq, %arg2, %c0_i32_2 : i32
    %5 = arith.andi %3, %4 : i1
    %6 = arith.extui %5 : i1 to i32
    %c0_i32_3 = arith.constant 0 : i32
    %7 = arith.cmpi ne, %6, %c0_i32_3 : i32
    scf.if %7 {
      %cst_15 = arith.constant 0.000000e+00 : f32
      %20 = vector.broadcast %cst_15 : f32 to vector<8x8xf32>
      %c0_16 = arith.constant 0 : index
      %c0_17 = arith.constant 0 : index
      %21 = vector.load %arg10[%c0_16, %c0_17] : memref<8x8xf32, #tpu.memory_space<vmem>>, vector<8x8xf32>
      tpu.vector_store %arg10[%c0_16, %c0_17], %20 {strides = array<i32>} : memref<8x8xf32, #tpu.memory_space<vmem>>, vector<8x8xf32>,
    } else {
    }
    %c0 = arith.constant 0 : index
    %c0_4 = arith.constant 0 : index
    %8 = vector.load %arg3[%c0, %c0_4] : memref<8x128xf32, #tpu.memory_space<vmem>>, vector<8x128xf32>
    %c0_5 = arith.constant 0 : index
    %c0_6 = arith.constant 0 : index
    %9 = vector.load %arg9[%c0_5, %c0_6] : memref<8x128xf32, #tpu.memory_space<vmem>>, vector<8x128xf32>
    %c0_7 = arith.constant 0 : index
    %c0_8 = arith.constant 0 : index
    %10 = vector.load %arg4[%c0_7, %c0_8] : memref<128x128xf32, #tpu.memory_space<vmem>>, vector<128x128xf32>
    %cst = arith.constant dense<0.000000e+00> : vector<8x128xf32>
    %11 = tpu.matmul %8, %10, %cst {dimension_numbers = #tpu.dot_dimension_numbers<[1], [1], [0], [0], [0, 0, 1, 0], [], []>} : vector<8x128xf32>, vector<128x128xf32>, vector<8x128xf32> -> vector<8x128xf32>
    %12 = arith.addf %9, %11 : vector<8x128xf32>
    %c0_9 = arith.constant 0 : index
    %c0_10 = arith.constant 0 : index
    %13 = vector.load %arg9[%c0_9, %c0_10] : memref<8x128xf32, #tpu.memory_space<vmem>>, vector<8x128xf32>
    tpu.vector_store %arg9[%c0_9, %c0_10], %12 {strides = array<i32>} : memref<8x128xf32, #tpu.memory_space<vmem>>, vector<8x128xf32>,
    %c0_i32_11 = arith.constant 0 : i32
    %14 = arith.cmpi eq, %arg1, %c0_i32_11 : i32
    %15 = arith.extui %14 : i1 to i32
    %c0_i32_12 = arith.constant 0 : i32
    %16 = arith.cmpi ne, %15, %c0_i32_12 : i32
    scf.if %16 {
      %c0_15 = arith.constant 0 : index
      %c0_16 = arith.constant 0 : index
      %20 = vector.load %arg10[%c0_15, %c0_16] : memref<8x8xf32, #tpu.memory_space<vmem>>, vector<8x8xf32>
      %c0_17 = arith.constant 0 : index
      %c0_18 = arith.constant 0 : index
      %21 = vector.load %arg6[%c0_17, %c0_18] : memref<8x128xf32, #tpu.memory_space<vmem>>, vector<8x128xf32>
      %cst_19 = arith.constant dense<0.000000e+00> : vector<8x8xf32>
      %22 = tpu.matmul %8, %21, %cst_19 {dimension_numbers = #tpu.dot_dimension_numbers<[1], [1], [0], [0], [0, 0, 1, 0], [], []>} : vector<8x128xf32>, vector<8x128xf32>, vector<8x8xf32> -> vector<8x8xf32>
      %23 = arith.addf %20, %22 : vector<8x8xf32>
      %c0_20 = arith.constant 0 : index
      %c0_21 = arith.constant 0 : index
      %24 = vector.load %arg10[%c0_20, %c0_21] : memref<8x8xf32, #tpu.memory_space<vmem>>, vector<8x8xf32>
      tpu.vector_store %arg10[%c0_20, %c0_21], %23 {strides = array<i32>} : memref<8x8xf32, #tpu.memory_space<vmem>>, vector<8x8xf32>,
    } else {
    }
    %c0_i32_13 = arith.constant 0 : i32
    %17 = arith.cmpi eq, %arg2, %c0_i32_13 : i32
    %18 = arith.extui %17 : i1 to i32
    %c0_i32_14 = arith.constant 0 : i32
    %19 = arith.cmpi ne, %18, %c0_i32_14 : i32
    scf.if %19 {
      %c0_15 = arith.constant 0 : index
      %c0_16 = arith.constant 0 : index
      %20 = vector.load %arg10[%c0_15, %c0_16] : memref<8x8xf32, #tpu.memory_space<vmem>>, vector<8x8xf32>
      %c0_17 = arith.constant 0 : index
      %c0_18 = arith.constant 0 : index
      %21 = vector.load %arg7[%c0_17, %c0_18] : memref<128x8xf32, #tpu.memory_space<vmem>>, vector<128x8xf32>
      %cst_19 = arith.constant dense<0.000000e+00> : vector<8x128xf32>
      %22 = tpu.matmul %20, %21, %cst_19 {dimension_numbers = #tpu.dot_dimension_numbers<[1], [1], [0], [0], [0, 0, 1, 0], [], []>} : vector<8x8xf32>, vector<128x8xf32>, vector<8x128xf32> -> vector<8x128xf32>
      %c0_20 = arith.constant 0 : index
      %c0_21 = arith.constant 0 : index
      %23 = vector.load %arg9[%c0_20, %c0_21] : memref<8x128xf32, #tpu.memory_space<vmem>>, vector<8x128xf32>
      %c0_22 = arith.constant 0 : index
      %c0_23 = arith.constant 0 : index
      %24 = vector.load %arg5[%c0_22, %c0_23] : memref<1x128xf32, #tpu.memory_space<vmem>>, vector<1x128xf32>
      %25 = vector.broadcast %24 : vector<1x128xf32> to vector<8x128xf32>
      %26 = arith.addf %23, %25 : vector<8x128xf32>
      %27 = arith.addf %26, %22 : vector<8x128xf32>
      %c0_24 = arith.constant 0 : index
      %c0_25 = arith.constant 0 : index
      %28 = vector.load %arg8[%c0_24, %c0_25] : memref<8x128xf32, #tpu.memory_space<vmem>>, vector<8x128xf32>
      tpu.vector_store %arg8[%c0_24, %c0_25], %27 {strides = array<i32>} : memref<8x128xf32, #tpu.memory_space<vmem>>, vector<8x128xf32>,
    } else {
    }
    return
  }
  func.func @transform_0(%arg0: i32, %arg1: i32, %arg2: i32) -> (i32, i32) {
    %c0_i32 = arith.constant 0 : i32
    return %arg0, %arg2 : i32, i32
  }
  func.func @transform_1(%arg0: i32, %arg1: i32, %arg2: i32) -> (i32, i32) {
    %c0_i32 = arith.constant 0 : i32
    return %arg1, %arg2 : i32, i32
  }
  func.func @transform_2(%arg0: i32, %arg1: i32, %arg2: i32) -> (i32, i32) {
    %c0_i32 = arith.constant 0 : i32
    %c0_i32_0 = arith.constant 0 : i32
    return %c0_i32, %arg1 : i32, i32
  }
  func.func @transform_3(%arg0: i32, %arg1: i32, %arg2: i32) -> (i32, i32) {
    %c0_i32 = arith.constant 0 : i32
    %c0_i32_0 = arith.constant 0 : i32
    return %c0_i32, %arg2 : i32, i32
  }
  func.func @transform_4(%arg0: i32, %arg1: i32, %arg2: i32) -> (i32, i32) {
    %c0_i32 = arith.constant 0 : i32
    %c0_i32_0 = arith.constant 0 : i32
    return %arg1, %c0_i32 : i32, i32
  }
  func.func @transform_5(%arg0: i32, %arg1: i32, %arg2: i32) -> (i32, i32) {
    %c0_i32 = arith.constant 0 : i32
    return %arg0, %arg1 : i32, i32
  }
}

</mosaic_0001>

<bundles_post_ra>
// kernel: tpu_custom_call.1
= control target key start
LH: loop header
LB: loop body
LE: loop exit
PB: predicated region body
PF: predicated region fallthrough
CT: control target
= control target key end

     0   :  { %10 = vsyncpa [#allocation5], 0  ;;  %s469_s0 = inlined_call_operand.vmem [shape: f32[8,128], index: 0, kind: input, shape index: {}]   ;;  %s470_s1 = inlined_call_operand.vmem [shape: f32[128,128], index: 1, kind: input, shape index: {}]   ;;  %s471_s2 = inlined_call_operand.vmem [shape: f32[1,128], index: 2, kind: input, shape index: {}]   ;;  %s472_s3 = inlined_call_operand.hbm [shape: f32[8,128], index: 3, kind: input, shape index: {}]   ;;  %s473_s4 = inlined_call_operand.vmem [shape: f32[128,8], index: 4, kind: input, shape index: {}]   ;;  %s474_s5 = inlined_call_operand.hbm [shape: f32[8,128], index: 5, kind: output, shape index: {}]  }
   0x1   :  { %11 = vsyncpa [#allocation6], 0  ;;  %s23_s20 = sshll.u32 %s472_s3, 4  ;;  %s305_s21 = smov [#allocation4]   ;;  %s24_s20 = int_to_ptr.hbm [resolvable:$true] %s23_s20 }
   0x2   :  { %s25_s22 = sshll.u32 %s305_s21, 4  ;;  %s26_s22 = int_to_ptr.vmem [resolvable:$true] %s25_s22 }
   0x3   :  { %28 = dma.hbm_to_vmem [thread:$0]  %s24_s20, 128, %s26_s22, [#allocation5]  }
   0x4   :  { %301 = dma.done.wait [#allocation5], 128  }
   0x5   :  { %302 = vsyncadd [#allocation5], 4294967168  ;;  %vm45_vm0 = vcmask 64512   ;;  %v91_v0 = vld [vmem:[#allocation4] sm:$0xff]  ;;  %v134_v1 = vld [vmem:[%s473_s4 + $0x78] sm:$0xff]  ;;  %v306_v14 = vmov 0.0  }
   0x6   :  { %107 = vmatpush.xpose.msra.mxu1 %v91_v0  ;;  %v347_v2 = vld [vmem:[%s469_s0] sm:$0xff]  ;;  %232 = vmatpush.xpose.msk.msra.mxu2 %vm45_vm0, %v134_v1  ;;  %v64_v3 = vld [vmem:[%s470_s1 + $0x78] sm:$0xff]  ;;  %v133_v4 = vld [vmem:[%s473_s4 + $0x70] sm:$0xff]  ;;  %46 = vst.msk [vmem:[#allocation3] sm:$0xff] %vm45_vm0, %v306_v14  ;;  %s307_s9 = smov [#allocation7]   ;;  %s222_s12 = sshll.u32 %s474_s5, 4  ;;  %s223_s12 = int_to_ptr.hbm [resolvable:$true] %s222_s12 }
   0x7   :  { %65 = vmatpush.xpose.msra.mxu0 %v64_v3  ;;  %v63_v5 = vld [vmem:[%s470_s1 + $0x70] sm:$0xff]  ;;  %v132_v6 = vld [vmem:[%s473_s4 + $0x68] sm:$0xff]  ;;  %v131_v8 = vld [vmem:[%s473_s4 + $0x60] sm:$0xff]  ;;  %s220_s10 = sshll.u32 %s307_s9, 4  ;;  %s221_s10 = int_to_ptr.vmem [resolvable:$true] %s220_s10 }
   0x8   :  { %v62_v7 = vld [vmem:[%s470_s1 + $0x68] sm:$0xff]  ;;  %v61_v9 = vld [vmem:[%s470_s1 + $0x60] sm:$0xff]  ;;  %v130_v10 = vld [vmem:[%s473_s4 + $0x58] sm:$0xff] }
   0x9   :  { %108 = vmatmul.f32.vlgmr.msra.gmra.mxu1 %v347_v2  ;;  %v60_v11 = vld [vmem:[%s470_s1 + $0x58] sm:$0xff]  ;;  %v129_v12 = vld [vmem:[%s473_s4 + $0x50] sm:$0xff]  ;;  %v128_v15 = vld [vmem:[%s473_s4 + $0x48] sm:$0xff] }
   0xa   :  { %233 = vmatpush.xpose.msk.msra.mxu2 %vm45_vm0, %v133_v4  ;;  %v59_v13 = vld [vmem:[%s470_s1 + $0x50] sm:$0xff]  ;;  %v58_v16 = vld [vmem:[%s470_s1 + $0x48] sm:$0xff]  ;;  %v127_v17 = vld [vmem:[%s473_s4 + $0x40] sm:$0xff] }
   0xb   :  { %66 = vmatpush.xpose.msra.mxu0 %v63_v5  ;;  %v57_v18 = vld [vmem:[%s470_s1 + $0x40] sm:$0xff]  ;;  %v126_v19 = vld [vmem:[%s473_s4 + $0x38] sm:$0xff]  ;;  %v125_v21 = vld [vmem:[%s473_s4 + $0x30] sm:$0xff] }
   0xc   :  { %v56_v20 = vld [vmem:[%s470_s1 + $0x38] sm:$0xff]  ;;  %v55_v22 = vld [vmem:[%s470_s1 + $0x30] sm:$0xff]  ;;  %v124_v23 = vld [vmem:[%s473_s4 + $0x28] sm:$0xff] }
   0xd   :  { %v54_v24 = vld [vmem:[%s470_s1 + $0x28] sm:$0xff]  ;;  %v123_v25 = vld [vmem:[%s473_s4 + $0x20] sm:$0xff]  ;;  %v122_v27 = vld [vmem:[%s473_s4 + $0x18] sm:$0xff] }
   0xe   :  { %234 = vmatpush.xpose.msk.msra.mxu2 %vm45_vm0, %v132_v6  ;;  %v53_v26 = vld [vmem:[%s470_s1 + $0x20] sm:$0xff]  ;;  %v52_v28 = vld [vmem:[%s470_s1 + $0x18] sm:$0xff]  ;;  %v121_v29 = vld [vmem:[%s473_s4 + $0x10] sm:$0xff] }
   0xf   :  { %67 = vmatpush.xpose.msra.mxu0 %v62_v7  ;;  %v51_v30 = vld [vmem:[%s470_s1 + $0x10] sm:$0xff]  ;;  %v120_v31 = vld [vmem:[%s473_s4 + $0x8] sm:$0xff]  ;;  %v119_v33 = vld [vmem:[%s473_s4] sm:$0xff] }
  0x10   :  { %v50_v32 = vld [vmem:[%s470_s1 + $0x8] sm:$0xff]  ;;  %v49_v34 = vld [vmem:[%s470_s1] sm:$0xff] }
  0x11   :  { %v90_v35 = vld [vmem:[#allocation3] sm:$0xff] }
  0x12   :  { %235 = vmatpush.xpose.msk.msra.mxu2 %vm45_vm0, %v131_v8  ;;  %v252_v39 = vld [vmem:[%s471_s2] ss:$0 sm:$0xff] }
  0x13   :  { %68 = vmatpush.xpose.msra.mxu0 %v61_v9 }
  0x16   :  { %236 = vmatpush.xpose.msk.msra.mxu2 %vm45_vm0, %v130_v10 }
  0x17   :  { %69 = vmatpush.xpose.msra.mxu0 %v60_v11 }
  0x1a   :  { %237 = vmatpush.xpose.msk.msra.mxu2 %vm45_vm0, %v129_v12 }
  0x1b   :  { %70 = vmatpush.xpose.msra.mxu0 %v59_v13 }
  0x1e   :  { %238 = vmatpush.xpose.msk.msra.mxu2 %vm45_vm0, %v128_v15 }
  0x1f   :  { %71 = vmatpush.xpose.msra.mxu0 %v58_v16 }
  0x22   :  { %239 = vmatpush.xpose.msk.msra.mxu2 %vm45_vm0, %v127_v17 }
  0x23   :  { %72 = vmatpush.xpose.msra.mxu0 %v57_v18 }
  0x26   :  { %240 = vmatpush.xpose.msk.msra.mxu2 %vm45_vm0, %v126_v19 }
  0x27   :  { %73 = vmatpush.xpose.msra.mxu0 %v56_v20 }
  0x2a   :  { %241 = vmatpush.xpose.msk.msra.mxu2 %vm45_vm0, %v125_v21 }
  0x2b   :  { %74 = vmatpush.xpose.msra.mxu0 %v55_v22 }
  0x2e   :  { %242 = vmatpush.xpose.msk.msra.mxu2 %vm45_vm0, %v124_v23 }
  0x2f   :  { %75 = vmatpush.xpose.msra.mxu0 %v54_v24 }
  0x32   :  { %243 = vmatpush.xpose.msk.msra.mxu2 %vm45_vm0, %v123_v25 }
  0x33   :  { %76 = vmatpush.xpose.msra.mxu0 %v53_v26 }
  0x36   :  { %244 = vmatpush.xpose.msk.msra.mxu2 %vm45_vm0, %v122_v27 }
  0x37   :  { %77 = vmatpush.xpose.msra.mxu0 %v52_v28 }
  0x3a   :  { %245 = vmatpush.xpose.msk.msra.mxu2 %vm45_vm0, %v121_v29 }
  0x3b   :  { %78 = vmatpush.xpose.msra.mxu0 %v51_v30 }
  0x3e   :  { %246 = vmatpush.xpose.msk.msra.mxu2 %vm45_vm0, %v120_v31 }
  0x3f   :  { %79 = vmatpush.xpose.msra.mxu0 %v50_v32 }
  0x42   :  { %247 = vmatpush.xpose.msk.msra.mxu2 %vm45_vm0, %v119_v33 }
  0x43   :  { %80 = vmatpush.xpose.msra.mxu0 %v49_v34 }
  0x46   :  { %81 = vmatmul.f32.vlgmr.msra.gmra.mxu0 %v347_v2 }
  0x86   :  { %v109_v36 = vpop.f32.mrf.mxu1 }
  0x87   :  { %v112_v37 = vadd.f32 %v109_v36, %v90_v35 }
  0x89   :  { %114 = vst.msk [vmem:[#allocation3] sm:$0xff] %vm45_vm0, %v112_v37 }
  0x90   :  { %v118_v38 = vld [vmem:[#allocation3] sm:$0xff] }
  0x91   :  { %248 = vmatmul.msk.f32.vlgmr.msra.gmra.mxu2 %vm45_vm0, %v118_v38 }
  0xc3   :  { %v82_v40 = vpop.f32.mrf.mxu0 }
  0xc4   :  { %v212_v41 = vadd.f32 %v252_v39, %v82_v40 }
 0x114   :  { %v204_v42 = vpop.f32.mrf.mxu2 }
 0x115   :  { %v213_v43 = vadd.f32 %v212_v41, %v204_v42 }
 0x117   :  { %214 = vst [vmem:[#allocation7] sm:$0xff] %v213_v43 }
 0x118   :  { %225 = dma.vmem_to_hbm [thread:$0]  %s221_s10, 128, %s223_s12, [#allocation6]  }
 0x119   :  { %303 = dma.done.wait [#allocation6], 128  }
 0x11a   :  { %304 = vsyncadd [#allocation6], 4294967168 }
 0x11b   :  { %230 = vsyncpa [#allocation5], 1 }
 0x11c   :  { %231 = vsyncpa [#allocation6], 1 }

</bundles_post_ra>
